<compile_context>
chip_gen: v7x
topology: tpu7x:2x2x1
jax: 0.10.0
libtpu: 0.0.40
codegen_flags: <defaults>
</compile_context>

<pallas_src>
import functools

import jax
import jax.numpy as jnp
import numpy as np
from jax.experimental import pallas as pl
from jax.experimental.pallas import tpu as pltpu


# ------------------------- Stage 1: sequential GRU ---------------------------
def _gru_recurrent_kernel(
    y_ref,       # (T*B, E)   embedded tokens, all timesteps (dropout_emb == 0)
    ctx_ref,     # (B, F)     ctx = features['feats'][0][0]
    w_ih_ref,    # (E, 3H)    GRU dec0 (pre-transposed: x @ W)
    w_hh_ref,    # (H, 3H)
    b_ih_ref,    # (1, 3H)
    b_hh_ref,    # (1, 3H)
    w_att_ref,   # (F, H)     att FF (tanh)
    b_att_ref,   # (1, H)
    x_out_ref,   # (T*B, H)   output: x_t = h_t * ct for every t
    gi_scr,      # VMEM (T*B, 3H) scratch: input-side GRU gates, all timesteps
    *,
    T: int,
    B: int,
):
    H = w_hh_ref.shape[0]

    # Loop-invariant context projection -- computed once per forward (hoisted).
    ct = jnp.tanh(
        jnp.dot(ctx_ref[...], w_att_ref[...], preferred_element_type=jnp.float32)
        + b_att_ref[...]
    )                                                     # (B, H)

    # Input-side GRU gates for all T steps in a single large MXU matmul.
    gi_scr[...] = (
        jnp.dot(y_ref[...], w_ih_ref[...], preferred_element_type=jnp.float32)
        + b_ih_ref[...]
    )

    w_hh = w_hh_ref[...]
    b_hh = b_hh_ref[...]

    def step(t, h):
        r0 = pl.multiple_of(t * B, B)
        gi = gi_scr[pl.ds(r0, B), :]                      # (B, 3H)
        gh = jnp.dot(h, w_hh, preferred_element_type=jnp.float32) + b_hh
        r = jax.nn.sigmoid(gi[:, 0:H] + gh[:, 0:H])       # PyTorch gate order r,z,n
        z = jax.nn.sigmoid(gi[:, H:2 * H] + gh[:, H:2 * H])
        n = jnp.tanh(gi[:, 2 * H:3 * H] + r * gh[:, 2 * H:3 * H])
        h1 = (1.0 - z) * n + z * h                        # (dropout_state == 0)
        x_out_ref[pl.ds(r0, B), :] = h1 * ct              # x_t = h1 * ct
        return h1                                         # recurrence carry

    h0 = jnp.zeros((B, H), jnp.float32)                   # _rnn_init_zero
    jax.lax.fori_loop(0, T, step, h0, unroll=(T <= 16))


# --------------- Stage 2: time-parallel attention / output head --------------
def _attn_output_kernel(
    x_ref,                 # (R, H)  chunk of (t, b) rows, R = t_chunk * B
    wq_ref, bq_ref,        # (H, L), (1, L)  query weights folded w/ head-repeat
    wk_ref, bk_ref,        # (H, L), (1, L)  key   weights folded w/ head-tile
    wv_ref, bv_ref,        # (H, L), (1, L)  value weights folded w/ head-tile
    ssum_ref,              # (L, P)  (1/head_dim)-scaled 0/1: sum each head_dim
                           #         chunk -> score per (i,j) pair
    gsum_ref,              # (P, P)  0/1: per-query-head group sum (softmax denom)
    wrep_ref,              # (P, L)  0/1: broadcast each attn weight across head_dim
    wfc_ref, bfc_ref,      # (L, H), (1, H)  fc_out folded with head-gather
    w_h2o_ref, b_h2o_ref,  # (H, E), (1, E)  hid2out (tanh)
    w_o2p_ref, b_o2p_ref,  # (E, V), (1, V)  out2prob
    probs_ref,             # (R, V)
):
    f32 = jnp.float32
    x = x_ref[...]                                                           # (R, H)
    q = jnp.dot(x, wq_ref[...], preferred_element_type=f32) + bq_ref[...]    # (R, L)
    k = jnp.dot(x, wk_ref[...], preferred_element_type=f32) + bk_ref[...]    # (R, L)
    v = jnp.dot(x, wv_ref[...], preferred_element_type=f32) + bv_ref[...]    # (R, L)

    # scores[(i,j)] = sum_d q_i[d] * k_j[d] / head_dim, all pairs at once
    # (the 1/head_dim scale is pre-folded into ssum).
    s = jnp.dot(q * k, ssum_ref[...], preferred_element_type=f32)            # (R, P)
    # Per-query-head softmax over j; shifting by the row max is the same shift
    # within every group, so the group softmax is unchanged and stable.
    e = jnp.exp(s - jnp.max(s, axis=-1, keepdims=True))                      # (R, P)
    den = jnp.dot(e, gsum_ref[...], preferred_element_type=f32)
    w = e * pl.reciprocal(den, approx=True)                                  # (R, P)

    # attention_output @ W_fc with the head-gather folded into wfc.
    wl = jnp.dot(w, wrep_ref[...], preferred_element_type=f32)               # (R, L)
    h2 = jnp.dot(wl * v, wfc_ref[...], preferred_element_type=f32) + bfc_ref[...]

    logit = jnp.tanh(
        jnp.dot(h2, w_h2o_ref[...], preferred_element_type=f32) + b_h2o_ref[...]
    )                                                                        # (R, E)
    lv = jnp.dot(logit, w_o2p_ref[...], preferred_element_type=f32) + b_o2p_ref[...]
    pe = jnp.exp(lv - jnp.max(lv, axis=-1, keepdims=True))
    inv = pl.reciprocal(jnp.sum(pe, axis=-1, keepdims=True), approx=True)
    probs_ref[...] = (pe * inv).astype(probs_ref.dtype)


# ------------------------------ helpers ---------------------------------------
def _mha_selector_mats(H, nh):
    """Constant 0/1 matrices expressing per-row multi-head attention as
    lane-dense matmuls. Lane c of the (nh*H)-wide tiles belongs to head pair
    p = c // head_dim = i*nh + j, within-head feature d = c % head_dim."""
    hd = H // nh
    P = nh * nh
    L = nh * H
    c = np.arange(L)
    pair, d = c // hd, c % hd
    i_head, j_head = pair // nh, pair % nh

    q_rep = np.zeros((H, L), np.float32)
    q_rep[i_head * hd + d, c] = 1.0            # lane c <- q[:, i*hd + d]
    kv_tile = np.zeros((H, L), np.float32)
    kv_tile[j_head * hd + d, c] = 1.0          # lane c <- k/v[:, j*hd + d]
    score_sum = np.zeros((L, P), np.float32)
    score_sum[c, pair] = 1.0                   # sum over d within each (i,j) pair
    p = np.arange(P)
    group_sum = (p[:, None] // nh == p[None, :] // nh).astype(np.float32)
    w_rep = np.zeros((P, L), np.float32)
    w_rep[pair, c] = 1.0                       # broadcast w[:, pair] over its lanes
    out_gather = np.zeros((L, H), np.float32)
    out_gather[c, i_head * hd + d] = 1.0       # sum over j back into head i's lanes
    return q_rep, kv_tile, score_sum, group_sum, w_rep, out_gather


def _pick_t_chunk(T, B, target_rows=512):
    """Largest divisor of T whose row-chunk (t_chunk*B) stays MXU-friendly."""
    best = 1
    for d in range(1, T + 1):
        if T % d == 0 and d * B <= target_rows:
            best = d
    return best


# ------------------------------ Wrapper ---------------------------------------
def generator_forward(y_ids, ctx, params, *, num_heads):
    """y_ids: (T, B) int32 tokens; ctx: (1, B, F) = features['feats'][0]."""
    T, B = y_ids.shape
    E = params["emb"].shape[1]
    H = params["w_hh"].shape[0]
    F = ctx.shape[-1]
    V = params["w_o2p"].shape[1]
    nh = num_heads
    hd = H // nh
    L = nh * H
    P = nh * nh

    # Glue: embedding lookup (gather) stays in plain JAX.
    # TODO(synk): could move in-kernel via scalar-prefetched ids + pl.Element.
    y_emb = params["emb"][y_ids].reshape(T * B, E).astype(jnp.float32)
    ctx0 = ctx[0].astype(jnp.float32)

    full = lambda shape: pl.BlockSpec(shape, lambda i: tuple(0 for _ in shape))

    # ---- Stage 1: sequential GRU recurrence (one grid step, fori_loop) ------
    x_flat = pl.pallas_call(
        functools.partial(_gru_recurrent_kernel, T=T, B=B),
        out_shape=jax.ShapeDtypeStruct((T * B, H), jnp.float32),
        grid_spec=pltpu.PrefetchScalarGridSpec(
            num_scalar_prefetch=0,
            grid=(1,),
            in_specs=[
                full((T * B, E)), full((B, F)),
                full((E, 3 * H)), full((H, 3 * H)),
                full((1, 3 * H)), full((1, 3 * H)),
                full((F, H)), full((1, H)),
            ],
            out_specs=full((T * B, H)),
            scratch_shapes=[pltpu.VMEM((T * B, 3 * H), jnp.float32)],
        ),
        compiler_params=pltpu.CompilerParams(dimension_semantics=("arbitrary",)),
    )(y_emb, ctx0, params["w_ih"], params["w_hh"], params["b_ih"], params["b_hh"],
      params["w_att"], params["b_att"])

    # ---- Fold the constant head-selector matrices into the learned weights --
    q_rep, kv_tile, score_sum, group_sum, w_rep, out_gather = _mha_selector_mats(H, nh)
    score_sum = score_sum * (1.0 / hd)         # fold the 1/head_dim score scale
    hi = jax.lax.Precision.HIGHEST
    fold = lambda a, b: jnp.dot(jnp.asarray(a), jnp.asarray(b), precision=hi)
    wq_f, bq_f = fold(params["wq"], q_rep), fold(params["bq"], q_rep)
    wk_f, bk_f = fold(params["wk"], kv_tile), fold(params["bk"], kv_tile)
    wv_f, bv_f = fold(params["wv"], kv_tile), fold(params["bv"], kv_tile)
    wfc_f = fold(out_gather, params["wfc"])

    # ---- Stage 2: time-parallel attention / output head ---------------------
    t_chunk = _pick_t_chunk(T, B)
    rows = t_chunk * B
    probs_flat = pl.pallas_call(
        _attn_output_kernel,
        out_shape=jax.ShapeDtypeStruct((T * B, V), jnp.float32),
        grid_spec=pltpu.PrefetchScalarGridSpec(
            num_scalar_prefetch=0,
            grid=(T // t_chunk,),
            in_specs=[
                pl.BlockSpec((rows, H), lambda i: (i, 0)),
                full((H, L)), full((1, L)),
                full((H, L)), full((1, L)),
                full((H, L)), full((1, L)),
                full((L, P)), full((P, P)), full((P, L)),
                full((L, H)), full((1, H)),
                full((H, E)), full((1, E)),
                full((E, V)), full((1, V)),
            ],
            out_specs=pl.BlockSpec((rows, V), lambda i: (i, 0)),
        ),
        compiler_params=pltpu.CompilerParams(
            dimension_semantics=("parallel",),
        ),
    )(x_flat, wq_f, bq_f, wk_f, bk_f, wv_f, bv_f,
      jnp.asarray(score_sum), jnp.asarray(group_sum), jnp.asarray(w_rep),
      wfc_f, params["bfc"], params["w_h2o"], params["b_h2o"],
      params["w_o2p"], params["b_o2p"])

    return probs_flat.reshape(T, B, V)


# ------------------------- Pure-JAX reference --------------------------------
def generator_reference(y_ids, ctx, params, *, num_heads):
    T, B = y_ids.shape
    H = params["w_hh"].shape[0]
    y_emb = params["emb"][y_ids]
    h = jnp.zeros((B, H), jnp.float32)
    ct = jnp.tanh(ctx[0] @ params["w_att"] + params["b_att"][0])
    probs = []
    hd = H // num_heads
    for t in range(T):
        x_in = y_emb[t]
        gi = x_in @ params["w_ih"] + params["b_ih"][0]
        gh = h @ params["w_hh"] + params["b_hh"][0]
        r = jax.nn.sigmoid(gi[:, :H] + gh[:, :H])
        z = jax.nn.sigmoid(gi[:, H:2 * H] + gh[:, H:2 * H])
        n = jnp.tanh(gi[:, 2 * H:] + r * gh[:, 2 * H:])
        h1 = (1 - z) * n + z * h
        x = h1 * ct
        q = (x @ params["wq"] + params["bq"][0]).reshape(B, num_heads, hd)
        k = (x @ params["wk"] + params["bk"][0]).reshape(B, num_heads, hd)
        v = (x @ params["wv"] + params["bv"][0]).reshape(B, num_heads, hd)
        scores = jnp.einsum("bhd,bgd->bhg", q, k) / hd
        w = jax.nn.softmax(scores, axis=-1)
        ao = jnp.einsum("bhg,bgd->bhd", w, v).reshape(B, H)
        h2 = ao @ params["wfc"] + params["bfc"][0]
        logit = jnp.tanh(h2 @ params["w_h2o"] + params["b_h2o"][0])
        prob = jax.nn.softmax(logit @ params["w_o2p"] + params["b_o2p"][0], axis=-1)
        probs.append(prob)
        h = h1
    return jnp.stack(probs, axis=0)


# --------------------------------- main ---------------------------------------
if __name__ == "__main__":
    T, B = 4, 8
    input_size = 32      # emb / input dim
    hidden_size = 32
    n_vocab = 32
    feature_size = 32
    num_heads = 4

    key = jax.random.PRNGKey(0)
    keys = jax.random.split(key, 24)
    s = 0.1

    def rnd(k, shape):
        return (s * jax.random.normal(k, shape)).astype(jnp.float32)

    params = {
        "emb":   rnd(keys[0], (n_vocab, input_size)),
        # GRUCell dec0 (stored pre-transposed so kernels do x @ W)
        "w_ih":  rnd(keys[1], (input_size, 3 * hidden_size)),
        "w_hh":  rnd(keys[2], (hidden_size, 3 * hidden_size)),
        "b_ih":  rnd(keys[3], (1, 3 * hidden_size)),
        "b_hh":  rnd(keys[4], (1, 3 * hidden_size)),
        # FF att (feature_size -> hidden, tanh)
        "w_att": rnd(keys[5], (feature_size, hidden_size)),
        "b_att": rnd(keys[6], (1, hidden_size)),
        # MultiHeadSelfAttention(hidden, num_heads, vocab_size=hidden)
        "wq":    rnd(keys[7], (hidden_size, hidden_size)),
        "bq":    rnd(keys[8], (1, hidden_size)),
        "wk":    rnd(keys[9], (hidden_size, hidden_size)),
        "bk":    rnd(keys[10], (1, hidden_size)),
        "wv":    rnd(keys[11], (hidden_size, hidden_size)),
        "bv":    rnd(keys[12], (1, hidden_size)),
        "wfc":   rnd(keys[13], (hidden_size, hidden_size)),
        "bfc":   rnd(keys[14], (1, hidden_size)),
        # hid2out: FF(hidden -> input, bias_zero=True, tanh)
        "w_h2o": rnd(keys[15], (hidden_size, input_size)),
        "b_h2o": jnp.zeros((1, input_size), jnp.float32),
        # out2prob: FF(input -> n_vocab), linear
        "w_o2p": rnd(keys[16], (input_size, n_vocab)),
        "b_o2p": rnd(keys[17], (1, n_vocab)),
    }

    y_ids = jax.random.randint(keys[18], (T, B), 0, n_vocab, dtype=jnp.int32)
    ctx = jax.random.normal(keys[19], (1, B, feature_size), dtype=jnp.float32)

    probs = generator_forward(y_ids, ctx, params, num_heads=num_heads)
    probs = jax.block_until_ready(probs)

    ref = generator_reference(y_ids, ctx, params, num_heads=num_heads)
    # Slightly looser tolerance: softmax denominators use the EUP approximate
    # reciprocal (pl.reciprocal(approx=True)) per the perf guidance.
    np.testing.assert_allclose(np.asarray(probs), np.asarray(ref),
                               rtol=2e-3, atol=2e-4)

    assert probs.shape == (T, B, n_vocab)
    print("KERNEL_OK")
</pallas_src>

<mosaic_0001>
module attributes {stable_mosaic.version = 11 : i64} {
  func.func @_gru_recurrent_kernel(%arg0: i32, %arg1: memref<32x32xf32, #tpu.memory_space<vmem>>, %arg2: memref<8x32xf32, #tpu.memory_space<vmem>>, %arg3: memref<32x96xf32, #tpu.memory_space<vmem>>, %arg4: memref<32x96xf32, #tpu.memory_space<vmem>>, %arg5: memref<1x96xf32, #tpu.memory_space<vmem>>, %arg6: memref<1x96xf32, #tpu.memory_space<vmem>>, %arg7: memref<32x32xf32, #tpu.memory_space<vmem>>, %arg8: memref<1x32xf32, #tpu.memory_space<vmem>>, %arg9: memref<32x32xf32, #tpu.memory_space<vmem>>, %arg10: memref<32x96xf32, #tpu.memory_space<vmem>>) attributes {dimension_semantics = [#tpu.dimension_semantics<arbitrary>], iteration_bounds = array<i64: 1>, scalar_prefetch = 0 : i64, scratch_operands = 1 : i64, tpu.core_type = #tpu.core_type<tc>, window_params = [{pipeline_mode = #tpu.pipeline_mode<synchronous>, transform_indices = @transform_0, window_bounds = array<i64: 32, 32>}, {pipeline_mode = #tpu.pipeline_mode<synchronous>, transform_indices = @transform_1, window_bounds = array<i64: 8, 32>}, {pipeline_mode = #tpu.pipeline_mode<synchronous>, transform_indices = @transform_2, window_bounds = array<i64: 32, 96>}, {pipeline_mode = #tpu.pipeline_mode<synchronous>, transform_indices = @transform_3, window_bounds = array<i64: 32, 96>}, {pipeline_mode = #tpu.pipeline_mode<synchronous>, transform_indices = @transform_4, window_bounds = array<i64: 1, 96>}, {pipeline_mode = #tpu.pipeline_mode<synchronous>, transform_indices = @transform_5, window_bounds = array<i64: 1, 96>}, {pipeline_mode = #tpu.pipeline_mode<synchronous>, transform_indices = @transform_6, window_bounds = array<i64: 32, 32>}, {pipeline_mode = #tpu.pipeline_mode<synchronous>, transform_indices = @transform_7, window_bounds = array<i64: 1, 32>}, {pipeline_mode = #tpu.pipeline_mode<synchronous>, transform_indices = @transform_8, window_bounds = array<i64: 32, 32>}]} {
    %c0 = arith.constant 0 : index
    %c0_0 = arith.constant 0 : index
    %0 = vector.load %arg2[%c0, %c0_0] : memref<8x32xf32, #tpu.memory_space<vmem>>, vector<8x32xf32>
    %c0_1 = arith.constant 0 : index
    %c0_2 = arith.constant 0 : index
    %1 = vector.load %arg7[%c0_1, %c0_2] : memref<32x32xf32, #tpu.memory_space<vmem>>, vector<32x32xf32>
    %cst = arith.constant dense<0.000000e+00> : vector<8x32xf32>
    %2 = tpu.matmul %0, %1, %cst {dimension_numbers = #tpu.dot_dimension_numbers<[1], [0], [0], [1], [0, 0, 1, 1], [], []>} : vector<8x32xf32>, vector<32x32xf32>, vector<8x32xf32> -> vector<8x32xf32>
    %c0_3 = arith.constant 0 : index
    %c0_4 = arith.constant 0 : index
    %3 = vector.load %arg8[%c0_3, %c0_4] : memref<1x32xf32, #tpu.memory_space<vmem>>, vector<1x32xf32>
    %4 = vector.broadcast %3 : vector<1x32xf32> to vector<8x32xf32>
    %5 = arith.addf %2, %4 : vector<8x32xf32>
    %6 = math.tanh %5 : vector<8x32xf32>
    %c0_5 = arith.constant 0 : index
    %c0_6 = arith.constant 0 : index
    %7 = vector.load %arg1[%c0_5, %c0_6] : memref<32x32xf32, #tpu.memory_space<vmem>>, vector<32x32xf32>
    %c0_7 = arith.constant 0 : index
    %c0_8 = arith.constant 0 : index
    %8 = vector.load %arg3[%c0_7, %c0_8] : memref<32x96xf32, #tpu.memory_space<vmem>>, vector<32x96xf32>
    %cst_9 = arith.constant dense<0.000000e+00> : vector<32x96xf32>
    %9 = tpu.matmul %7, %8, %cst_9 {dimension_numbers = #tpu.dot_dimension_numbers<[1], [0], [0], [1], [0, 0, 1, 1], [], []>} : vector<32x32xf32>, vector<32x96xf32>, vector<32x96xf32> -> vector<32x96xf32>
    %c0_10 = arith.constant 0 : index
    %c0_11 = arith.constant 0 : index
    %10 = vector.load %arg5[%c0_10, %c0_11] : memref<1x96xf32, #tpu.memory_space<vmem>>, vector<1x96xf32>
    %11 = vector.broadcast %10 : vector<1x96xf32> to vector<32x96xf32>
    %12 = arith.addf %9, %11 : vector<32x96xf32>
    %c0_12 = arith.constant 0 : index
    %c0_13 = arith.constant 0 : index
    %13 = vector.load %arg10[%c0_12, %c0_13] : memref<32x96xf32, #tpu.memory_space<vmem>>, vector<32x96xf32>
    tpu.vector_store %arg10[%c0_12, %c0_13], %12 {strides = array<i32>} : memref<32x96xf32, #tpu.memory_space<vmem>>, vector<32x96xf32>,
    %c0_14 = arith.constant 0 : index
    %c0_15 = arith.constant 0 : index
    %14 = vector.load %arg4[%c0_14, %c0_15] : memref<32x96xf32, #tpu.memory_space<vmem>>, vector<32x96xf32>
    %c0_16 = arith.constant 0 : index
    %c0_17 = arith.constant 0 : index
    %15 = vector.load %arg6[%c0_16, %c0_17] : memref<1x96xf32, #tpu.memory_space<vmem>>, vector<1x96xf32>
    %cst_18 = arith.constant 0.000000e+00 : f32
    %16 = vector.broadcast %cst_18 : f32 to vector<8x32xf32>
    %c0_i32 = arith.constant 0 : i32
    %c8_i32 = arith.constant 8 : i32
    %17 = arith.muli %c0_i32, %c8_i32 : i32
    %18 = tpu.assume_multiple %17, 8 : i32
    %19 = arith.index_cast %18 : i32 to index
    %c0_19 = arith.constant 0 : index
    %20 = vector.load %arg10[%19, %c0_19] : memref<32x96xf32, #tpu.memory_space<vmem>>, vector<8x96xf32>
    %cst_20 = arith.constant dense<0.000000e+00> : vector<8x96xf32>
    %21 = tpu.matmul %16, %14, %cst_20 {dimension_numbers = #tpu.dot_dimension_numbers<[1], [0], [0], [1], [0, 0, 1, 1], [], []>} : vector<8x32xf32>, vector<32x96xf32>, vector<8x96xf32> -> vector<8x96xf32>
    %22 = vector.broadcast %15 : vector<1x96xf32> to vector<8x96xf32>
    %23 = arith.addf %21, %22 : vector<8x96xf32>
    %24 = vector.extract_strided_slice %20 {offsets = [0, 0], sizes = [8, 32], strides = [1, 1]} : vector<8x96xf32> to vector<8x32xf32>
    %25 = vector.extract_strided_slice %23 {offsets = [0, 0], sizes = [8, 32], strides = [1, 1]} : vector<8x96xf32> to vector<8x32xf32>
    %26 = arith.addf %24, %25 : vector<8x32xf32>
    %27 = arith.negf %26 : vector<8x32xf32>
    %28 = math.exp %27 : vector<8x32xf32>
    %cst_21 = arith.constant 1.000000e+00 : f32
    %29 = vector.broadcast %cst_21 : f32 to vector<8x32xf32>
    %30 = arith.addf %29, %28 : vector<8x32xf32>
    %31 = arith.divf %29, %30 : vector<8x32xf32>
    %32 = vector.extract_strided_slice %20 {offsets = [0, 32], sizes = [8, 32], strides = [1, 1]} : vector<8x96xf32> to vector<8x32xf32>
    %33 = vector.extract_strided_slice %23 {offsets = [0, 32], sizes = [8, 32], strides = [1, 1]} : vector<8x96xf32> to vector<8x32xf32>
    %34 = arith.addf %32, %33 : vector<8x32xf32>
    %35 = arith.negf %34 : vector<8x32xf32>
    %36 = math.exp %35 : vector<8x32xf32>
    %cst_22 = arith.constant 1.000000e+00 : f32
    %37 = vector.broadcast %cst_22 : f32 to vector<8x32xf32>
    %38 = arith.addf %37, %36 : vector<8x32xf32>
    %39 = arith.divf %37, %38 : vector<8x32xf32>
    %40 = vector.extract_strided_slice %20 {offsets = [0, 64], sizes = [8, 32], strides = [1, 1]} : vector<8x96xf32> to vector<8x32xf32>
    %41 = vector.extract_strided_slice %23 {offsets = [0, 64], sizes = [8, 32], strides = [1, 1]} : vector<8x96xf32> to vector<8x32xf32>
    %42 = arith.mulf %31, %41 : vector<8x32xf32>
    %43 = arith.addf %40, %42 : vector<8x32xf32>
    %44 = math.tanh %43 : vector<8x32xf32>
    %cst_23 = arith.constant 1.000000e+00 : f32
    %45 = vector.broadcast %cst_23 : f32 to vector<8x32xf32>
    %46 = arith.subf %45, %39 : vector<8x32xf32>
    %47 = arith.mulf %46, %44 : vector<8x32xf32>
    %48 = arith.mulf %39, %16 : vector<8x32xf32>
    %49 = arith.addf %47, %48 : vector<8x32xf32>
    %50 = arith.mulf %49, %6 : vector<8x32xf32>
    %51 = arith.index_cast %18 : i32 to index
    %c0_24 = arith.constant 0 : index
    %52 = vector.load %arg9[%51, %c0_24] : memref<32x32xf32, #tpu.memory_space<vmem>>, vector<8x32xf32>
    tpu.vector_store %arg9[%51, %c0_24], %50 {strides = array<i32>} : memref<32x32xf32, #tpu.memory_space<vmem>>, vector<8x32xf32>,
    %c1_i32 = arith.constant 1 : i32
    %c8_i32_25 = arith.constant 8 : i32
    %53 = arith.muli %c1_i32, %c8_i32_25 : i32
    %54 = tpu.assume_multiple %53, 8 : i32
    %55 = arith.index_cast %54 : i32 to index
    %c0_26 = arith.constant 0 : index
    %56 = vector.load %arg10[%55, %c0_26] : memref<32x96xf32, #tpu.memory_space<vmem>>, vector<8x96xf32>
    %cst_27 = arith.constant dense<0.000000e+00> : vector<8x96xf32>
    %57 = tpu.matmul %49, %14, %cst_27 {dimension_numbers = #tpu.dot_dimension_numbers<[1], [0], [0], [1], [0, 0, 1, 1], [], []>} : vector<8x32xf32>, vector<32x96xf32>, vector<8x96xf32> -> vector<8x96xf32>
    %58 = vector.broadcast %15 : vector<1x96xf32> to vector<8x96xf32>
    %59 = arith.addf %57, %58 : vector<8x96xf32>
    %60 = vector.extract_strided_slice %56 {offsets = [0, 0], sizes = [8, 32], strides = [1, 1]} : vector<8x96xf32> to vector<8x32xf32>
    %61 = vector.extract_strided_slice %59 {offsets = [0, 0], sizes = [8, 32], strides = [1, 1]} : vector<8x96xf32> to vector<8x32xf32>
    %62 = arith.addf %60, %61 : vector<8x32xf32>
    %63 = arith.negf %62 : vector<8x32xf32>
    %64 = math.exp %63 : vector<8x32xf32>
    %cst_28 = arith.constant 1.000000e+00 : f32
    %65 = vector.broadcast %cst_28 : f32 to vector<8x32xf32>
    %66 = arith.addf %65, %64 : vector<8x32xf32>
    %67 = arith.divf %65, %66 : vector<8x32xf32>
    %68 = vector.extract_strided_slice %56 {offsets = [0, 32], sizes = [8, 32], strides = [1, 1]} : vector<8x96xf32> to vector<8x32xf32>
    %69 = vector.extract_strided_slice %59 {offsets = [0, 32], sizes = [8, 32], strides = [1, 1]} : vector<8x96xf32> to vector<8x32xf32>
    %70 = arith.addf %68, %69 : vector<8x32xf32>
    %71 = arith.negf %70 : vector<8x32xf32>
    %72 = math.exp %71 : vector<8x32xf32>
    %cst_29 = arith.constant 1.000000e+00 : f32
    %73 = vector.broadcast %cst_29 : f32 to vector<8x32xf32>
    %74 = arith.addf %73, %72 : vector<8x32xf32>
    %75 = arith.divf %73, %74 : vector<8x32xf32>
    %76 = vector.extract_strided_slice %56 {offsets = [0, 64], sizes = [8, 32], strides = [1, 1]} : vector<8x96xf32> to vector<8x32xf32>
    %77 = vector.extract_strided_slice %59 {offsets = [0, 64], sizes = [8, 32], strides = [1, 1]} : vector<8x96xf32> to vector<8x32xf32>
    %78 = arith.mulf %67, %77 : vector<8x32xf32>
    %79 = arith.addf %76, %78 : vector<8x32xf32>
    %80 = math.tanh %79 : vector<8x32xf32>
    %cst_30 = arith.constant 1.000000e+00 : f32
    %81 = vector.broadcast %cst_30 : f32 to vector<8x32xf32>
    %82 = arith.subf %81, %75 : vector<8x32xf32>
    %83 = arith.mulf %82, %80 : vector<8x32xf32>
    %84 = arith.mulf %75, %49 : vector<8x32xf32>
    %85 = arith.addf %83, %84 : vector<8x32xf32>
    %86 = arith.mulf %85, %6 : vector<8x32xf32>
    %87 = arith.index_cast %54 : i32 to index
    %c0_31 = arith.constant 0 : index
    %88 = vector.load %arg9[%87, %c0_31] : memref<32x32xf32, #tpu.memory_space<vmem>>, vector<8x32xf32>
    tpu.vector_store %arg9[%87, %c0_31], %86 {strides = array<i32>} : memref<32x32xf32, #tpu.memory_space<vmem>>, vector<8x32xf32>,
    %c2_i32 = arith.constant 2 : i32
    %c8_i32_32 = arith.constant 8 : i32
    %89 = arith.muli %c2_i32, %c8_i32_32 : i32
    %90 = tpu.assume_multiple %89, 8 : i32
    %91 = arith.index_cast %90 : i32 to index
    %c0_33 = arith.constant 0 : index
    %92 = vector.load %arg10[%91, %c0_33] : memref<32x96xf32, #tpu.memory_space<vmem>>, vector<8x96xf32>
    %cst_34 = arith.constant dense<0.000000e+00> : vector<8x96xf32>
    %93 = tpu.matmul %85, %14, %cst_34 {dimension_numbers = #tpu.dot_dimension_numbers<[1], [0], [0], [1], [0, 0, 1, 1], [], []>} : vector<8x32xf32>, vector<32x96xf32>, vector<8x96xf32> -> vector<8x96xf32>
    %94 = vector.broadcast %15 : vector<1x96xf32> to vector<8x96xf32>
    %95 = arith.addf %93, %94 : vector<8x96xf32>
    %96 = vector.extract_strided_slice %92 {offsets = [0, 0], sizes = [8, 32], strides = [1, 1]} : vector<8x96xf32> to vector<8x32xf32>
    %97 = vector.extract_strided_slice %95 {offsets = [0, 0], sizes = [8, 32], strides = [1, 1]} : vector<8x96xf32> to vector<8x32xf32>
    %98 = arith.addf %96, %97 : vector<8x32xf32>
    %99 = arith.negf %98 : vector<8x32xf32>
    %100 = math.exp %99 : vector<8x32xf32>
    %cst_35 = arith.constant 1.000000e+00 : f32
    %101 = vector.broadcast %cst_35 : f32 to vector<8x32xf32>
    %102 = arith.addf %101, %100 : vector<8x32xf32>
    %103 = arith.divf %101, %102 : vector<8x32xf32>
    %104 = vector.extract_strided_slice %92 {offsets = [0, 32], sizes = [8, 32], strides = [1, 1]} : vector<8x96xf32> to vector<8x32xf32>
    %105 = vector.extract_strided_slice %95 {offsets = [0, 32], sizes = [8, 32], strides = [1, 1]} : vector<8x96xf32> to vector<8x32xf32>
    %106 = arith.addf %104, %105 : vector<8x32xf32>
    %107 = arith.negf %106 : vector<8x32xf32>
    %108 = math.exp %107 : vector<8x32xf32>
    %cst_36 = arith.constant 1.000000e+00 : f32
    %109 = vector.broadcast %cst_36 : f32 to vector<8x32xf32>
    %110 = arith.addf %109, %108 : vector<8x32xf32>
    %111 = arith.divf %109, %110 : vector<8x32xf32>
    %112 = vector.extract_strided_slice %92 {offsets = [0, 64], sizes = [8, 32], strides = [1, 1]} : vector<8x96xf32> to vector<8x32xf32>
    %113 = vector.extract_strided_slice %95 {offsets = [0, 64], sizes = [8, 32], strides = [1, 1]} : vector<8x96xf32> to vector<8x32xf32>
    %114 = arith.mulf %103, %113 : vector<8x32xf32>
    %115 = arith.addf %112, %114 : vector<8x32xf32>
    %116 = math.tanh %115 : vector<8x32xf32>
    %cst_37 = arith.constant 1.000000e+00 : f32
    %117 = vector.broadcast %cst_37 : f32 to vector<8x32xf32>
    %118 = arith.subf %117, %111 : vector<8x32xf32>
    %119 = arith.mulf %118, %116 : vector<8x32xf32>
    %120 = arith.mulf %111, %85 : vector<8x32xf32>
    %121 = arith.addf %119, %120 : vector<8x32xf32>
    %122 = arith.mulf %121, %6 : vector<8x32xf32>
    %123 = arith.index_cast %90 : i32 to index
    %c0_38 = arith.constant 0 : index
    %124 = vector.load %arg9[%123, %c0_38] : memref<32x32xf32, #tpu.memory_space<vmem>>, vector<8x32xf32>
    tpu.vector_store %arg9[%123, %c0_38], %122 {strides = array<i32>} : memref<32x32xf32, #tpu.memory_space<vmem>>, vector<8x32xf32>,
    %c3_i32 = arith.constant 3 : i32
    %c8_i32_39 = arith.constant 8 : i32
    %125 = arith.muli %c3_i32, %c8_i32_39 : i32
    %126 = tpu.assume_multiple %125, 8 : i32
    %127 = arith.index_cast %126 : i32 to index
    %c0_40 = arith.constant 0 : index
    %128 = vector.load %arg10[%127, %c0_40] : memref<32x96xf32, #tpu.memory_space<vmem>>, vector<8x96xf32>
    %cst_41 = arith.constant dense<0.000000e+00> : vector<8x96xf32>
    %129 = tpu.matmul %121, %14, %cst_41 {dimension_numbers = #tpu.dot_dimension_numbers<[1], [0], [0], [1], [0, 0, 1, 1], [], []>} : vector<8x32xf32>, vector<32x96xf32>, vector<8x96xf32> -> vector<8x96xf32>
    %130 = vector.broadcast %15 : vector<1x96xf32> to vector<8x96xf32>
    %131 = arith.addf %129, %130 : vector<8x96xf32>
    %132 = vector.extract_strided_slice %128 {offsets = [0, 0], sizes = [8, 32], strides = [1, 1]} : vector<8x96xf32> to vector<8x32xf32>
    %133 = vector.extract_strided_slice %131 {offsets = [0, 0], sizes = [8, 32], strides = [1, 1]} : vector<8x96xf32> to vector<8x32xf32>
    %134 = arith.addf %132, %133 : vector<8x32xf32>
    %135 = arith.negf %134 : vector<8x32xf32>
    %136 = math.exp %135 : vector<8x32xf32>
    %cst_42 = arith.constant 1.000000e+00 : f32
    %137 = vector.broadcast %cst_42 : f32 to vector<8x32xf32>
    %138 = arith.addf %137, %136 : vector<8x32xf32>
    %139 = arith.divf %137, %138 : vector<8x32xf32>
    %140 = vector.extract_strided_slice %128 {offsets = [0, 32], sizes = [8, 32], strides = [1, 1]} : vector<8x96xf32> to vector<8x32xf32>
    %141 = vector.extract_strided_slice %131 {offsets = [0, 32], sizes = [8, 32], strides = [1, 1]} : vector<8x96xf32> to vector<8x32xf32>
    %142 = arith.addf %140, %141 : vector<8x32xf32>
    %143 = arith.negf %142 : vector<8x32xf32>
    %144 = math.exp %143 : vector<8x32xf32>
    %cst_43 = arith.constant 1.000000e+00 : f32
    %145 = vector.broadcast %cst_43 : f32 to vector<8x32xf32>
    %146 = arith.addf %145, %144 : vector<8x32xf32>
    %147 = arith.divf %145, %146 : vector<8x32xf32>
    %148 = vector.extract_strided_slice %128 {offsets = [0, 64], sizes = [8, 32], strides = [1, 1]} : vector<8x96xf32> to vector<8x32xf32>
    %149 = vector.extract_strided_slice %131 {offsets = [0, 64], sizes = [8, 32], strides = [1, 1]} : vector<8x96xf32> to vector<8x32xf32>
    %150 = arith.mulf %139, %149 : vector<8x32xf32>
    %151 = arith.addf %148, %150 : vector<8x32xf32>
    %152 = math.tanh %151 : vector<8x32xf32>
    %cst_44 = arith.constant 1.000000e+00 : f32
    %153 = vector.broadcast %cst_44 : f32 to vector<8x32xf32>
    %154 = arith.subf %153, %147 : vector<8x32xf32>
    %155 = arith.mulf %154, %152 : vector<8x32xf32>
    %156 = arith.mulf %147, %121 : vector<8x32xf32>
    %157 = arith.addf %155, %156 : vector<8x32xf32>
    %158 = arith.mulf %157, %6 : vector<8x32xf32>
    %159 = arith.index_cast %126 : i32 to index
    %c0_45 = arith.constant 0 : index
    %160 = vector.load %arg9[%159, %c0_45] : memref<32x32xf32, #tpu.memory_space<vmem>>, vector<8x32xf32>
    tpu.vector_store %arg9[%159, %c0_45], %158 {strides = array<i32>} : memref<32x32xf32, #tpu.memory_space<vmem>>, vector<8x32xf32>,
    %c4_i32 = arith.constant 4 : i32
    return
  }
  func.func @transform_0(%arg0: i32) -> (i32, i32) {
    %c0_i32 = arith.constant 0 : i32
    %c0_i32_0 = arith.constant 0 : i32
    %c0_i32_1 = arith.constant 0 : i32
    return %c0_i32, %c0_i32_0 : i32, i32
  }
  func.func @transform_1(%arg0: i32) -> (i32, i32) {
    %c0_i32 = arith.constant 0 : i32
    %c0_i32_0 = arith.constant 0 : i32
    %c0_i32_1 = arith.constant 0 : i32
    return %c0_i32, %c0_i32_0 : i32, i32
  }
  func.func @transform_2(%arg0: i32) -> (i32, i32) {
    %c0_i32 = arith.constant 0 : i32
    %c0_i32_0 = arith.constant 0 : i32
    %c0_i32_1 = arith.constant 0 : i32
    return %c0_i32, %c0_i32_0 : i32, i32
  }
  func.func @transform_3(%arg0: i32) -> (i32, i32) {
    %c0_i32 = arith.constant 0 : i32
    %c0_i32_0 = arith.constant 0 : i32
    %c0_i32_1 = arith.constant 0 : i32
    return %c0_i32, %c0_i32_0 : i32, i32
  }
  func.func @transform_4(%arg0: i32) -> (i32, i32) {
    %c0_i32 = arith.constant 0 : i32
    %c0_i32_0 = arith.constant 0 : i32
    %c0_i32_1 = arith.constant 0 : i32
    return %c0_i32, %c0_i32_0 : i32, i32
  }
  func.func @transform_5(%arg0: i32) -> (i32, i32) {
    %c0_i32 = arith.constant 0 : i32
    %c0_i32_0 = arith.constant 0 : i32
    %c0_i32_1 = arith.constant 0 : i32
    return %c0_i32, %c0_i32_0 : i32, i32
  }
  func.func @transform_6(%arg0: i32) -> (i32, i32) {
    %c0_i32 = arith.constant 0 : i32
    %c0_i32_0 = arith.constant 0 : i32
    %c0_i32_1 = arith.constant 0 : i32
    return %c0_i32, %c0_i32_0 : i32, i32
  }
  func.func @transform_7(%arg0: i32) -> (i32, i32) {
    %c0_i32 = arith.constant 0 : i32
    %c0_i32_0 = arith.constant 0 : i32
    %c0_i32_1 = arith.constant 0 : i32
    return %c0_i32, %c0_i32_0 : i32, i32
  }
  func.func @transform_8(%arg0: i32) -> (i32, i32) {
    %c0_i32 = arith.constant 0 : i32
    %c0_i32_0 = arith.constant 0 : i32
    %c0_i32_1 = arith.constant 0 : i32
    return %c0_i32, %c0_i32_0 : i32, i32
  }
}

</mosaic_0001>

<bundles_post_ra>
// kernel: tpu_custom_call.1
= control target key start
LH: loop header
LB: loop body
LE: loop exit
PB: predicated region body
PF: predicated region fallthrough
CT: control target
= control target key end

     0   :  { %13 = vsyncpa [#allocation4], 0  ;;  %s1342_s0 = inlined_call_operand.hbm [shape: f32[32,32], index: 0, kind: input, shape index: {}]   ;;  %s1343_s1 = inlined_call_operand.hbm [shape: f32[8,32], index: 1, kind: input, shape index: {}]   ;;  %s1344_s2 = inlined_call_operand.hbm [shape: f32[32,96], index: 2, kind: input, shape index: {}]   ;;  %s1345_s3 = inlined_call_operand.hbm [shape: f32[32,96], index: 3, kind: input, shape index: {}]   ;;  %s1346_s4 = inlined_call_operand.vmem [shape: f32[1,96], index: 4, kind: input, shape index: {}]   ;;  %s1347_s5 = inlined_call_operand.vmem [shape: f32[1,96], index: 5, kind: input, shape index: {}]   ;;  %s1348_s6 = inlined_call_operand.hbm [shape: f32[32,32], index: 6, kind: input, shape index: {}]   ;;  %s1349_s7 = inlined_call_operand.vmem [shape: f32[1,32], index: 7, kind: input, shape index: {}]   ;;  %s1350_s8 = inlined_call_operand.hbm [shape: f32[32,32], index: 8, kind: output, shape index: {}]  }
   0x1   :  { %14 = vsyncpa [#allocation7], 0 }
   0x2   :  { %15 = vsyncpa [#allocation10], 0 }
   0x3   :  { %16 = vsyncpa [#allocation5], 0  ;;  %s1105_s27 = smov [#allocation6]   ;;  %s965_s9 = scalar_lea.hbm %s1343_s1, 128 }
   0x4   :  { %s35_s28 = sshll.u32 %s1105_s27, 4  ;;  %p966_p0 = scmp.ne.s32.totalorder %s1343_s1, %s965_s9  ;;  %s36_s28 = int_to_ptr.vmem [resolvable:$true] %s35_s28 }
   0x5   :  { %p969_p1 = scmp.lt.u32.totalorder %s965_s9, %s1343_s1 }
   0x7   :  { %p971_p2 = pnand %p969_p1, %p966_p0 }
   0x9   :  { %974 = shalt.err (!%p971_p2)
}
   0xa   :  { %s975_s14 = scalar_lea.vmem %s36_s28, 128  ;;  %p980_p4 = scmp.lt.s32.totalorder %s36_s28, %s36_s28 }
   0xb   :  { %p976_p3 = scmp.ne.s32.totalorder %s36_s28, %s975_s14  ;;  %p981_p5 = scmp.lt.s32.totalorder %s975_s14, %s975_s14 }
   0xd   :  { %p982_p6 = por %p981_p5, %p980_p4 }
   0xf   :  { %p983_p7 = pnand %p982_p6, %p976_p3 }
  0x11   :  { %986 = shalt.err (!%p983_p7)
}
  0x12   :  { %38 = dma.hbm_to_vmem [thread:$0]  %s1343_s1, 128, %s36_s28, [#allocation7]  }
  0x13   :  { %s1106_s17 = smov [#allocation9]   ;;  %s1107_s19 = smov [#allocation3]  }
  0x14   :  { %s56_s18 = sshll.u32 %s1106_s17, 4  ;;  %s22_s20 = sshll.u32 %s1107_s19, 4  ;;  %s57_s18 = int_to_ptr.vmem [resolvable:$true] %s56_s18  ;;  %s23_s20 = int_to_ptr.vmem [resolvable:$true] %s22_s20 }
  0x15   :  { %s987_s23 = scalar_lea.hbm %s1345_s3, 512 }
  0x16   :  { %p988_p8 = scmp.ne.s32.totalorder %s1345_s3, %s987_s23  ;;  %p991_p9 = scmp.lt.u32.totalorder %s987_s23, %s1345_s3 }
  0x18   :  { %p993_p10 = pnand %p991_p9, %p988_p8 }
  0x1a   :  { %996 = shalt.err (!%p993_p10)
}
  0x1b   :  { %s997_s1 = scalar_lea.vmem %s57_s18, 512  ;;  %p1002_p12 = scmp.lt.s32.totalorder %s57_s18, %s57_s18 }
  0x1c   :  { %p998_p11 = scmp.ne.s32.totalorder %s57_s18, %s997_s1  ;;  %p1003_p13 = scmp.lt.s32.totalorder %s997_s1, %s997_s1 }
  0x1e   :  { %p1004_p0 = por %p1003_p13, %p1002_p12 }
  0x20   :  { %p1005_p1 = pnand %p1004_p0, %p998_p11 }
  0x22   :  { %1008 = shalt.err (!%p1005_p1)
}
  0x23   :  { %s1108_s28 = smov 128   ;;  %s1109_s29 = smov 8  }
  0x24   :  { %62 = dma.hbm_to_vmem [thread:$0]  %s1345_s3, 512, %s57_s18, [#allocation10], %s1108_s28, %s1108_s28, %s1109_s29  }
  0x25   :  { %s1009_s12 = scalar_lea.hbm %s1342_s0, 512 }
  0x26   :  { %p1010_p2 = scmp.ne.s32.totalorder %s1342_s0, %s1009_s12  ;;  %p1013_p3 = scmp.lt.u32.totalorder %s1009_s12, %s1342_s0 }
  0x28   :  { %p1015_p4 = pnand %p1013_p3, %p1010_p2 }
  0x2a   :  { %1018 = shalt.err (!%p1015_p4)
}
  0x2b   :  { %s1019_s17 = scalar_lea.vmem %s23_s20, 512  ;;  %p1024_p6 = scmp.lt.s32.totalorder %s23_s20, %s23_s20 }
  0x2c   :  { %p1020_p5 = scmp.ne.s32.totalorder %s23_s20, %s1019_s17  ;;  %p1025_p7 = scmp.lt.s32.totalorder %s1019_s17, %s1019_s17 }
  0x2e   :  { %p1026_p8 = por %p1025_p7, %p1024_p6 }
  0x30   :  { %p1027_p9 = pnand %p1026_p8, %p1020_p5 }
  0x32   :  { %1030 = shalt.err (!%p1027_p9)
}
  0x33   :  { %28 = dma.hbm_to_vmem [thread:$0]  %s1342_s0, 512, %s23_s20, [#allocation4], %s1108_s28, %s1108_s28, %s1109_s29  }
  0x34   :  { %s1110_s19 = smov [#allocation8]   ;;  %s1111_s22 = smov [#allocation11]  }
  0x35   :  { %s44_s21 = sshll.u32 %s1110_s19, 4  ;;  %s72_s23 = sshll.u32 %s1111_s22, 4  ;;  %s45_s21 = int_to_ptr.vmem [resolvable:$true] %s44_s21  ;;  %s73_s23 = int_to_ptr.vmem [resolvable:$true] %s72_s23 }
  0x36   :  { %s1031_s26 = scalar_lea.hbm %s1344_s2, 512 }
  0x37   :  { %p1032_p10 = scmp.ne.s32.totalorder %s1344_s2, %s1031_s26  ;;  %p1035_p11 = scmp.lt.u32.totalorder %s1031_s26, %s1344_s2 }
  0x39   :  { %p1037_p12 = pnand %p1035_p11, %p1032_p10 }
  0x3b   :  { %1040 = shalt.err (!%p1037_p12)
}
  0x3c   :  { %s1041_s0 = scalar_lea.vmem %s45_s21, 512  ;;  %p1046_p0 = scmp.lt.s32.totalorder %s45_s21, %s45_s21 }
  0x3d   :  { %p1042_p13 = scmp.ne.s32.totalorder %s45_s21, %s1041_s0  ;;  %p1047_p1 = scmp.lt.s32.totalorder %s1041_s0, %s1041_s0 }
  0x3f   :  { %p1048_p2 = por %p1047_p1, %p1046_p0 }
  0x41   :  { %p1049_p3 = pnand %p1048_p2, %p1042_p13 }
  0x43   :  { %1052 = shalt.err (!%p1049_p3)
}
  0x44   :  { %50 = dma.hbm_to_vmem [thread:$0]  %s1344_s2, 512, %s45_s21, [#allocation7], %s1108_s28, %s1108_s28, %s1109_s29  }
  0x45   :  { %s1053_s13 = scalar_lea.hbm %s1348_s6, 512 }
  0x46   :  { %p1054_p4 = scmp.ne.s32.totalorder %s1348_s6, %s1053_s13  ;;  %p1057_p5 = scmp.lt.u32.totalorder %s1053_s13, %s1348_s6 }
  0x48   :  { %p1059_p6 = pnand %p1057_p5, %p1054_p4 }
  0x4a   :  { %1062 = shalt.err (!%p1059_p6)
}
  0x4b   :  { %s1063_s3 = scalar_lea.vmem %s73_s23, 512  ;;  %p1068_p8 = scmp.lt.s32.totalorder %s73_s23, %s73_s23 }
  0x4c   :  { %p1064_p7 = scmp.ne.s32.totalorder %s73_s23, %s1063_s3  ;;  %p1069_p9 = scmp.lt.s32.totalorder %s1063_s3, %s1063_s3 }
  0x4e   :  { %p1070_p10 = por %p1069_p9, %p1068_p8 }
  0x50   :  { %p1071_p11 = pnand %p1070_p10, %p1064_p7 }
  0x52   :  { %1074 = shalt.err (!%p1071_p11)
}
  0x53   :  { %78 = dma.hbm_to_vmem [thread:$0]  %s1348_s6, 512, %s73_s23, [#allocation10], %s1108_s28, %s1108_s28, %s1109_s29  }
  0x54   :  { %1097 = dma.done.wait [#allocation4], 512  }
  0x55   :  { %1098 = vsyncadd [#allocation4], 4294966784 }
  0x56   :  { %1099 = dma.done.wait [#allocation7], 640  }
  0x57   :  { %1100 = vsyncadd [#allocation7], 4294966656 }
  0x58   :  { %1101 = dma.done.wait [#allocation10], 1024  }
  0x59   :  { %1102 = vsyncadd [#allocation10], 4294966272  ;;  %v1112_v0 = vmov 0.0|0.0   ;;  %vm1113_vm0 = vmmov 0   ;;  %v1114_v1 = vmov 0.0   ;;  %v97_v2 = vld [vmem:[#allocation11] sm:$0xff] }
  0x5a   :  { %887 = vmatprep.subr.bf16.mxu0 %v1112_v0  ;;  %826 = vmatprep.mubr.msk.f32.mxu0 %vm1113_vm0, %v1114_v1  ;;  %v98_v3 = vld [vmem:[#allocation11 + $0x8] sm:$0xff]  ;;  %v187_v4 = vld [vmem:[#allocation8] sm:$0xff]  ;;  %v99_v7 = vld [vmem:[#allocation11 + $0x10] sm:$0xff]  ;;  %vm108_vm1 = vcmask 261120   ;;  %vm295_vm2 = vcmask 785408   ;;  %s1115_s23 = smov 64  }
  0x5b   :  { %v888_v5 = vpack.c.bf16 %v98_v3, %v97_v2  ;;  %v188_v6 = vld [vmem:[#allocation8 + $0x8] sm:$0xff]  ;;  %v100_v8 = vld [vmem:[#allocation11 + $0x18] sm:$0xff]  ;;  %v189_v10 = vld [vmem:[#allocation8 + $0x10] sm:$0xff]  ;;  %s1117_s25 = smov 32  }
  0x5c   :  { %v893_v9 = vpack.c.bf16 %v188_v6, %v187_v4  ;;  %v190_v11 = vld [vmem:[#allocation8 + $0x18] sm:$0xff]  ;;  %v891_v12 = vpack.c.bf16 %v100_v8, %v99_v7  ;;  %v300_v15 = vld [vmem:[#allocation9] sm:$0xff]  ;;  %v301_v16 = vld [vmem:[#allocation9 + $0x8] sm:$0xff] }
  0x5d   :  { %889 = vmatpush3.bf16.msra.mxu0 %v888_v5  ;;  %v897_v13 = vpack.c.bf16 %v190_v11, %v189_v10  ;;  %v183_v14 = vld [vmem:[#allocation3] sm:$0xff]  ;;  %v1241_v18 = vpack.c.bf16 %v301_v16, %v300_v15  ;;  %v302_v19 = vld [vmem:[#allocation9 + $0x10] sm:$0xff]  ;;  %v184_v21 = vld [vmem:[#allocation3 + $0x8] sm:$0xff] }
  0x5e   :  { %894 = vmatprep.subr.bf16.mxu1 %v893_v9  ;;  %890 = vmatprep.subr.bf16.mxu0 %v1112_v0  ;;  %v96_v17 = vld [vmem:[#allocation6] sm:$0xff]  ;;  %v185_v44 = vld [vmem:[#allocation3 + $0x10] sm:$0xff]  ;;  %v186_v45 = vld [vmem:[#allocation3 + $0x18] sm:$0xff] }
  0x5f   :  { %896 = vmatpush3.bf16.msra.mxu1 %v893_v9  ;;  %837 = vmatprep.mubr.msk.f32.mxu1 %vm108_vm1, %v183_v14  ;;  %v303_v20 = vld [vmem:[#allocation9 + $0x18] sm:$0xff] }
  0x60   :  { %898 = vmatprep.subr.bf16.mxu1 %v897_v13  ;;  %v1247_v22 = vpack.c.bf16 %v303_v20, %v302_v19  ;;  %v772_v25 = vld [vmem:[%s1346_s4] ss:$0 sm:$0xff]  ;;  %s1116_s4 = smov 96  }
  0x61   :  { %892 = vmatpush3.bf16.msra.mxu0 %v891_v12  ;;  %v1275_v30 = vld [vmem:[%s1347_s5] ss:$0 sm:$0xff] }
  0x62   :  { %901 = vmatprep.subr.bf16.mxu0 %v1112_v0 }
  0x63   :  { %900 = vmatpush3.bf16.msra.mxu1 %v897_v13 }
  0x64   :  { %827 = vmatmul.mubr.msk.f32.vlgmr.msra.gmra.mrb[0].mxu0 %vm108_vm1, %v96_v17  ;;  %907 = vmatprep.subr.bf16.mxu1 %v1112_v0 }
  0x65   :  { %903 = vmatpush3.bf16.msra.mxu0 %v1241_v18  ;;  %851 = vmatprep.mubr.msk.f32.mxu0 %vm1113_vm0, %v1114_v1 }
  0x66   :  { %838 = vmatmul.mubr.msk.f32.vlgmr.msra.gmra.mrb[0].mxu1 %vm108_vm1, %v184_v21  ;;  %904 = vmatprep.subr.bf16.mxu0 %v1112_v0 }
  0x67   :  { %909 = vmatpush3.bf16.msra.mxu1 %v1241_v18  ;;  %840 = vmatprep.mubr.msk.f32.mxu1 %vm108_vm1, %v185_v44 }
  0x68   :  { %910 = vmatprep.subr.bf16.mxu1 %v1112_v0 }
  0x69   :  { %906 = vmatpush3.bf16.msra.mxu0 %v1247_v22 }
  0x6a   :  { %913 = vmatprep.subr.bf16.mxu0 %v1112_v0  ;;  %841 = vmatmul.mubr.msk.f32.gmra.mrb[2].mxu1 %vm108_vm1, %v186_v45 }
  0x6b   :  { %912 = vmatpush3.bf16.msra.mxu1 %v1247_v22  ;;  %862 = vmatprep.mubr.msk.f32.mxu1 %vm1113_vm0, %v1114_v1 }
  0x6c   :  { %852 = vmatmul.mubr.f32.vlgmr.msra.gmra.mrb[2].mxu0 %v1114_v1  ;;  %919 = vmatprep.subr.bf16.mxu1 %v1112_v0 }
  0x6d   :  { %915 = vmatpush3.bf16.msra.mxu0 %v1241_v18  ;;  %873 = vmatprep.mubr.msk.f32.mxu0 %vm1113_vm0, %v1114_v1 }
  0x6e   :  { %916 = vmatprep.subr.bf16.mxu0 %v1112_v0 }
  0x71   :  { %918 = vmatpush3.bf16.msra.mxu0 %v1247_v22 }
 0x137   :  { %v1265_v23 = vpop.f32.mrb[0].mxu0 }
 0x138   :  { %v828_v24 = vpop.f32.mrb[1].mxu0 }
 0x139   :  { %v839_v26 = vpop.f32.mrb[0].mxu1 }
 0x13a   :  { %v282_v27 = vadd.f32 %v839_v26, %v772_v25  ;;  %v276_v28 = vpop.f32.mrb[1].mxu1 }
 0x13b   :  { %v277_v29 = vadd.f32 %v772_v25, %v276_v28 }
 0x13c   :  { %297 = vst.msk [vmem:[#allocation2 + $0x8] sm:$0xff] %vm295_vm2, %v282_v27 }
 0x13d   :  { %296 = vst.msk [vmem:[#allocation2] sm:$0xff] %vm295_vm2, %v277_v29  ;;  %v842_v52 = vpop.f32.mrb[2].mxu1 }
 0x13e   :  { %v292_v53 = vadd.f32 %v842_v52, %v772_v25  ;;  %v286_v54 = vpop.f32.mrb[3].mxu1 }
 0x13f   :  { %v381_v31 = vpop.f32.mrb[2].mxu0  ;;  %v287_v55 = vadd.f32 %v772_v25, %v286_v54 }
 0x140   :  { %v382_v32 = vadd.f32 %v1275_v30, %v381_v31  ;;  %v853_v33 = vpop.f32.mrb[3].mxu0  ;;  %299 = vst.msk [vmem:[#allocation2 + $0x18] sm:$0xff] %vm295_vm2, %v292_v53 }
 0x141   :  { %298 = vst.msk [vmem:[#allocation2 + $0x10] sm:$0xff] %vm295_vm2, %v287_v55 }
 0x142   :  { %393 = vrot.lane.b32.xlu0 %v382_v32, %s1115_s23 }
 0x143   :  { %v422_v60 = vld [vmem:[#allocation2 + $0x8] sm:$0xff] }
 0x144   :  { %v305_v34 = vld [vmem:[#allocation2] sm:$0xff] }
 0x145   :  { %v385_v35 = vadd.f32 %v382_v32, %v305_v34 }
 0x147   :  { %v778_v36 = vmul.f32 -1.442695, %v385_v35 }
 0x148   :  { %v532_v16 = vld [vmem:[#allocation2 + $0x10] sm:$0xff] }
 0x149   :  { %939 = vpow2.f32 %v778_v36 }
 0x153   :  { %v940_v37 = vpop.eup %939 }
 0x154   :  { %v389_v38 = vadd.f32 1.0, %v940_v37 }
 0x156   :  { %941 = vrcp.f32 %v389_v38  ;;  %v642_v38 = vld [vmem:[#allocation2 + $0x18] sm:$0xff] }
 0x160   :  { %v942_v39 = vpop.eup %941 }
 0x161   :  { %v403_v47 = vsub.f32 1.0, %v942_v39  ;;  %v409_v49 = vmul.f32 0.0, %v942_v39 }
 0x1b4   :  { %v394_v40 = vpop.permute.xlu0 %393 }
 0x1b5   :  { %v396_v41 = vmul.f32 %v942_v39, %v394_v40 }
 0x1b7   :  { %398 = vrot.lane.b32.xlu0 %v396_v41, %s1115_s23 }
 0x229   :  { %v399_v42 = vpop.permute.xlu0 %398 }
 0x22a   :  { %v401_v43 = vadd.f32 %v399_v42, %v305_v34 }
 0x22c   :  { %943 = vtanh.f32 %v401_v43  ;;  %v770_v43 = vld [vmem:[%s1349_s7] ss:$0 sm:$0xff]  ;;  %s1118_s7 = smov [#allocation12]  }
 0x22d   :  { %v179_v44 = vadd.f32 %v770_v43, %v1265_v23  ;;  %s756_s26 = sshll.u32 %s1118_s7, 4  ;;  %s757_s26 = int_to_ptr.vmem [resolvable:$true] %s756_s26 }
 0x22e   :  { %s1075_s27 = scalar_lea.vmem %s757_s26, 512  ;;  %p1080_p13 = scmp.lt.s32.totalorder %s757_s26, %s757_s26 }
 0x22f   :  { %p1076_p12 = scmp.ne.s32.totalorder %s757_s26, %s1075_s27  ;;  %p1081_p0 = scmp.lt.s32.totalorder %s1075_s27, %s1075_s27 }
 0x231   :  { %p1082_p1 = por %p1081_p0, %p1080_p13 }
 0x233   :  { %p1083_p2 = pnand %p1082_p1, %p1076_p12 }
 0x236   :  { %v944_v46 = vpop.eup %943 }
 0x237   :  { %405 = vrot.lane.b32.xlu1 %v944_v46, %s1116_s4 }
 0x2a9   :  { %v406_v48 = vpop.permute.xlu1 %405 }
 0x2aa   :  { %v408_v50 = vmul.f32 %v406_v48, %v403_v47 }
 0x2ac   :  { %v1285_v51 = vadd.f32 %v409_v49, %v408_v50 }
 0x2ae   :  { %424 = vrot.lane.b32.xlu1 %v1285_v51, %s1116_s4 }
 0x320   :  { %v425_v56 = vpop.permute.xlu1 %424 }
 0x321   :  { %863 = vmatmul.mubr.msk.f32.vlgmr.msra.gmra.mrb[4].mxu1 %vm108_vm1, %v425_v56 }
 0x322   :  { %921 = vmatpush3.bf16.msra.mxu1 %v1241_v18  ;;  %884 = vmatprep.mubr.msk.f32.mxu1 %vm1113_vm0, %v1114_v1 }
 0x323   :  { %922 = vmatprep.subr.bf16.mxu1 %v1112_v0 }
 0x326   :  { %924 = vmatpush3.bf16.msra.mxu1 %v1247_v22 }
 0x3f4   :  { %v494_v57 = vpop.f32.mrb[4].mxu1 }
 0x3f5   :  { %v495_v58 = vadd.f32 %v1275_v30, %v494_v57  ;;  %v864_v59 = vpop.f32.mrb[5].mxu1 }
 0x3f7   :  { %506 = vrot.lane.b32.xlu0 %v495_v58, %s1115_s23  ;;  %v498_v61 = vadd.f32 %v495_v58, %v422_v60 }
 0x3f9   :  { %v780_v62 = vmul.f32 -1.442695, %v498_v61 }
 0x3fb   :  { %945 = vpow2.f32 %v780_v62 }
 0x405   :  { %v946_v63 = vpop.eup %945 }
 0x406   :  { %v502_v2 = vadd.f32 1.0, %v946_v63 }
 0x408   :  { %947 = vrcp.f32 %v502_v2 }
 0x412   :  { %v948_v3 = vpop.eup %947 }
 0x413   :  { %v516_v7 = vsub.f32 1.0, %v948_v3  ;;  %v522_v9 = vmul.f32 %v948_v3, %v1285_v51 }
 0x469   :  { %v507_v4 = vpop.permute.xlu0 %506 }
 0x46a   :  { %v509_v1 = vmul.f32 %v948_v3, %v507_v4 }
 0x46c   :  { %511 = vrot.lane.b32.xlu1 %v509_v1, %s1115_s23 }
 0x4de   :  { %v512_v0 = vpop.permute.xlu1 %511 }
 0x4df   :  { %v514_v5 = vadd.f32 %v512_v0, %v422_v60 }
 0x4e1   :  { %949 = vtanh.f32 %v514_v5 }
 0x4eb   :  { %v950_v6 = vpop.eup %949 }
 0x4ec   :  { %518 = vrot.lane.b32.xlu0 %v950_v6, %s1116_s4 }
 0x55e   :  { %v519_v8 = vpop.permute.xlu0 %518 }
 0x55f   :  { %v521_v10 = vmul.f32 %v519_v8, %v516_v7 }
 0x561   :  { %v523_v11 = vadd.f32 %v522_v9, %v521_v10 }
 0x563   :  { %534 = vrot.lane.b32.xlu1 %v523_v11, %s1116_s4 }
 0x5d5   :  { %v535_v12 = vpop.permute.xlu1 %534 }
 0x5d6   :  { %874 = vmatmul.mubr.msk.f32.vlgmr.msra.gmra.mrb[4].mxu0 %vm108_vm1, %v535_v12 }
 0x6a9   :  { %v604_v13 = vpop.f32.mrb[4].mxu0 }
 0x6aa   :  { %v605_v14 = vadd.f32 %v1275_v30, %v604_v13  ;;  %v875_v15 = vpop.f32.mrb[5].mxu0 }
 0x6ac   :  { %616 = vrot.lane.b32.xlu0 %v605_v14, %s1115_s23  ;;  %v608_v17 = vadd.f32 %v605_v14, %v532_v16 }
 0x6ae   :  { %v782_v18 = vmul.f32 -1.442695, %v608_v17 }
 0x6b0   :  { %951 = vpow2.f32 %v782_v18 }
 0x6ba   :  { %v952_v19 = vpop.eup %951 }
 0x6bb   :  { %v612_v20 = vadd.f32 1.0, %v952_v19 }
 0x6bd   :  { %953 = vrcp.f32 %v612_v20 }
 0x6c7   :  { %v954_v21 = vpop.eup %953 }
 0x6c8   :  { %v626_v28 = vsub.f32 1.0, %v954_v21  ;;  %v632_v31 = vmul.f32 %v954_v21, %v523_v11 }
 0x71e   :  { %v617_v22 = vpop.permute.xlu0 %616 }
 0x71f   :  { %v619_v24 = vmul.f32 %v954_v21, %v617_v22 }
 0x721   :  { %621 = vrot.lane.b32.xlu1 %v619_v24, %s1115_s23 }
 0x793   :  { %v622_v25 = vpop.permute.xlu1 %621 }
 0x794   :  { %v624_v26 = vadd.f32 %v622_v25, %v532_v16 }
 0x796   :  { %955 = vtanh.f32 %v624_v26 }
 0x7a0   :  { %v956_v27 = vpop.eup %955 }
 0x7a1   :  { %628 = vrot.lane.b32.xlu0 %v956_v27, %s1116_s4 }
 0x813   :  { %v629_v29 = vpop.permute.xlu0 %628 }
 0x814   :  { %v631_v32 = vmul.f32 %v629_v29, %v626_v28 }
 0x816   :  { %v633_v33 = vadd.f32 %v632_v31, %v631_v32 }
 0x818   :  { %644 = vrot.lane.b32.xlu1 %v633_v33, %s1116_s4 }
 0x88a   :  { %v645_v34 = vpop.permute.xlu1 %644 }
 0x88b   :  { %885 = vmatmul.mubr.msk.f32.vlgmr.msra.gmra.mrb[6].mxu1 %vm108_vm1, %v645_v34 }
 0x95e   :  { %v714_v35 = vpop.f32.mrb[6].mxu1 }
 0x95f   :  { %v715_v36 = vadd.f32 %v1275_v30, %v714_v35  ;;  %v886_v37 = vpop.f32.mrb[7].mxu1 }
 0x961   :  { %726 = vrot.lane.b32.xlu0 %v715_v36, %s1115_s23  ;;  %v718_v39 = vadd.f32 %v715_v36, %v642_v38 }
 0x963   :  { %v784_v40 = vmul.f32 -1.442695, %v718_v39 }
 0x965   :  { %957 = vpow2.f32 %v784_v40 }
 0x96f   :  { %v958_v41 = vpop.eup %957 }
 0x970   :  { %v722_v42 = vadd.f32 1.0, %v958_v41 }
 0x972   :  { %959 = vrcp.f32 %v722_v42 }
 0x973   :  { %961 = vtanh.f32 %v179_v44 }
 0x97c   :  { %v960_v45 = vpop.eup %959 }
 0x97d   :  { %v962_v47 = vpop.eup %961  ;;  %v736_v56 = vsub.f32 1.0, %v960_v45  ;;  %v742_v58 = vmul.f32 %v960_v45, %v633_v33 }
 0x9d3   :  { %v727_v46 = vpop.permute.xlu0 %726 }
 0x9d4   :  { %v729_v30 = vmul.f32 %v960_v45, %v727_v46 }
 0x9d6   :  { %731 = vrot.lane.b32.xlu1 %v729_v30, %s1115_s23 }
 0x9da   :  { %412 = vrot.lane.b32.xlu1 %v962_v47, %s1117_s25 }
 0xa48   :  { %v732_v48 = vpop.permute.xlu1 %731 }
 0xa49   :  { %v734_v49 = vadd.f32 %v732_v48, %v642_v38 }
 0xa4b   :  { %963 = vtanh.f32 %v734_v49 }
 0xa4c   :  { %v413_v50 = vpop.permute.xlu1 %412 }
 0xa4d   :  { %v524_v52 = vmul.f32 %v523_v11, %v413_v50  ;;  %v415_v23 = vmul.f32 %v413_v50, %v1285_v51  ;;  %v634_v54 = vmul.f32 %v633_v33, %v413_v50 }
 0xa4f   :  { %526 = vrot.lane.b32.xlu1 %v524_v52, %s1116_s4 }
 0xa55   :  { %v964_v53 = vpop.eup %963 }
 0xa56   :  { %738 = vrot.lane.b32.xlu0 %v964_v53, %s1116_s4 }
 0xa5a   :  { %417 = vrot.lane.b32.xlu0 %v415_v23, %s1116_s4 }
 0xa5e   :  { %636 = vrot.lane.b32.xlu0 %v634_v54, %s1116_s4 }
 0xac1   :  { %v527_v55 = vpop.permute.xlu1 %526 }
 0xac2   :  { %530 = vst.msk [vmem:[#allocation12 + $0x8] sm:$0xff] %vm108_vm1, %v527_v55 }
 0xac8   :  { %v739_v57 = vpop.permute.xlu0 %738 }
 0xac9   :  { %v741_v59 = vmul.f32 %v739_v57, %v736_v56 }
 0xacb   :  { %v743_v60 = vadd.f32 %v742_v58, %v741_v59 }
 0xacc   :  { %v418_v61 = vpop.permute.xlu0 %417 }
 0xacd   :  { %420 = vst.msk [vmem:[#allocation12] sm:$0xff] %vm108_vm1, %v418_v61  ;;  %v744_v62 = vmul.f32 %v743_v60, %v413_v50 }
 0xacf   :  { %746 = vrot.lane.b32.xlu1 %v744_v62, %s1116_s4 }
 0xad0   :  { %v637_v51 = vpop.permute.xlu0 %636 }
 0xad1   :  { %640 = vst.msk [vmem:[#allocation12 + $0x10] sm:$0xff] %vm108_vm1, %v637_v51 }
 0xb41   :  { %v747_v63 = vpop.permute.xlu1 %746 }
 0xb42   :  { %750 = vst.msk [vmem:[#allocation12 + $0x18] sm:$0xff] %vm108_vm1, %v747_v63 }
 0xb43   :  { %1086 = shalt.err (!%p1083_p2)
}
 0xb44   :  { %s1087_s9 = scalar_lea.hbm %s1350_s8, 512 }
 0xb45   :  { %p1088_p3 = scmp.ne.s32.totalorder %s1350_s8, %s1087_s9  ;;  %p1091_p4 = scmp.lt.u32.totalorder %s1087_s9, %s1350_s8 }
 0xb47   :  { %p1093_p5 = pnand %p1091_p4, %p1088_p3 }
 0xb49   :  { %1096 = shalt.err (!%p1093_p5)
}
 0xb4a   :  { %762 = dma.vmem_to_hbm [thread:$0]  %s757_s26, 512, %s1350_s8, [#allocation5], %s1108_s28, %s1108_s28, %s1109_s29  }
 0xb4b   :  { %1103 = dma.done.wait [#allocation5], 512  }
 0xb4c   :  { %1104 = vsyncadd [#allocation5], 4294966784 }
 0xb4d   :  { %766 = vsyncpa [#allocation4], 1 }
 0xb4e   :  { %767 = vsyncpa [#allocation7], 1 }
 0xb4f   :  { %768 = vsyncpa [#allocation10], 1 }
 0xb50   :  { %769 = vsyncpa [#allocation5], 1 }

</bundles_post_ra>
